<compile_context>
chip_gen: v7x
topology: tpu7x:2x2x1
jax: 0.10.0
libtpu: 0.0.40
codegen_flags: <defaults>
</compile_context>

<pallas_src>
import functools
import math

import jax
import jax.numpy as jnp
from jax.experimental import pallas as pl
from jax.experimental.pallas import tpu as pltpu

_LANES = 128
_SUBLANES = 8
_TARGET_TILE_BYTES = 4 * 1024 * 1024    # per input per grid step
_TARGET_CHUNK_BYTES = 128 * 1024        # per input per fused inner-loop chunk
_VMEM_LIMIT_BYTES = 40 * 1024 * 1024    # 2 inputs x 2 buffers x 4 MiB + slack


def _mse_partial_kernel(pred_ref, truth_ref, out_ref, *,
                        tile_rows, chunk_rows, valid_rows, mask_needed):
    """Writes this tile's (8,128) partial sums of (pred - truth)**2."""
    num_chunks = tile_rows // chunk_rows
    tile_row0 = pl.program_id(0) * tile_rows

    def body(c, acc):
        r0 = pl.multiple_of(c * chunk_rows, chunk_rows)
        p = pred_ref[pl.ds(r0, chunk_rows), :].astype(jnp.float32)
        t = truth_ref[pl.ds(r0, chunk_rows), :].astype(jnp.float32)
        d = p - t
        sq = d * d
        if mask_needed:
            # Only the last grid tile can overrun `valid_rows`; the Pallas path
            # guarantees n_elems % 128 == 0, so a row-granular mask is exact.
            ridx = (tile_row0 + r0) + jax.lax.broadcasted_iota(
                jnp.int32, sq.shape, 0)
            sq = jnp.where(ridx < valid_rows, sq, jnp.float32(0.0))
        if chunk_rows > _SUBLANES:
            # Fold the chunk's rows into one (8,128) vreg with pure VPU adds.
            sq = jnp.sum(
                sq.reshape(chunk_rows // _SUBLANES, _SUBLANES, _LANES), axis=0)
        return acc + sq

    acc0 = jnp.zeros((_SUBLANES, _LANES), jnp.float32)
    if num_chunks % 8 == 0 and num_chunks > 8:
        unroll = 8
    elif num_chunks <= 8:
        unroll = True
    else:
        unroll = 1
    out_ref[...] = jax.lax.fori_loop(0, num_chunks, body, acc0, unroll=unroll)


def lsgan_loss(pred, truth, *, tile_rows=None, min_pallas_elems=1 << 20):
    """Equivalent of lsgan().forward(pred, truth) == mean((pred - truth)**2)."""
    assert pred.shape == truth.shape, "MSELoss requires matching shapes"
    n_elems = pred.size

    # Fast path: tiny inputs (pallas_call fixed cost dominates and blocks XLA
    # fusion) or sizes that cannot be viewed as (rows, 128) without a padding
    # copy (which would ~double HBM traffic for a bandwidth-bound kernel).
    # TODO(synk): a separate tiny-tail pass would keep huge non-128-multiple
    # inputs on the Pallas path; not worth it for typical discriminator maps.
    if (n_elems < min_pallas_elems
            or n_elems % _LANES != 0
            or n_elems < 2 * _SUBLANES * _LANES):
        d = pred.astype(jnp.float32) - truth.astype(jnp.float32)
        return jnp.mean(d * d)

    rows = n_elems // _LANES
    itemsize = jnp.dtype(pred.dtype).itemsize

    if tile_rows is None:
        # ~4 MiB of input per operand per step regardless of dtype (8192 rows
        # f32, 16384 rows bf16) -> per-step overhead is amortized on all of
        # v5e/v6e/v7x while 2 inputs x 2 pipeline buffers stay under the
        # explicit 40 MiB VMEM limit (v7x has only 64 MiB physical per TC).
        tile_rows = (_TARGET_TILE_BYTES // (_LANES * itemsize))
        tile_rows = max(_SUBLANES, (tile_rows // _SUBLANES) * _SUBLANES)
    else:
        assert tile_rows % _SUBLANES == 0, "tile_rows must be a multiple of 8"

    if rows <= tile_rows:
        # Fits in one step: split into >= 2 tiles so the "parallel" grid axis
        # feeds both TensorCores on v7x (no effect on single-TC v5e/v6e).
        half = (rows + 1) // 2
        tile_rows = ((half + _SUBLANES - 1) // _SUBLANES) * _SUBLANES

    num_tiles = pl.cdiv(rows, tile_rows)
    mask_needed = (rows % tile_rows) != 0

    # Fused inner-loop chunk: <=128 KiB per operand, always a multiple of 8
    # rows and an exact divisor of tile_rows.
    chunk_target = max(_SUBLANES,
                       (_TARGET_CHUNK_BYTES // (_LANES * itemsize)))
    chunk_rows = math.gcd(tile_rows, chunk_target)

    p2 = pred.reshape(rows, _LANES)
    t2 = truth.reshape(rows, _LANES)

    kernel = functools.partial(
        _mse_partial_kernel,
        tile_rows=tile_rows, chunk_rows=chunk_rows,
        valid_rows=rows, mask_needed=mask_needed)

    cost = pl.CostEstimate(
        flops=3 * n_elems,                       # sub + mul + reduce-add
        transcendentals=0,
        bytes_accessed=(2 * n_elems * itemsize
                        + num_tiles * _SUBLANES * _LANES * 4),
    )

    partials = pl.pallas_call(
        kernel,
        out_shape=jax.ShapeDtypeStruct((num_tiles * _SUBLANES, _LANES),
                                       jnp.float32),
        grid_spec=pltpu.PrefetchScalarGridSpec(
            num_scalar_prefetch=0,
            grid=(num_tiles,),
            in_specs=[
                pl.BlockSpec((tile_rows, _LANES), lambda i: (i, 0)),
                pl.BlockSpec((tile_rows, _LANES), lambda i: (i, 0)),
            ],
            out_specs=pl.BlockSpec((_SUBLANES, _LANES), lambda i: (i, 0)),
        ),
        compiler_params=pltpu.CompilerParams(
            dimension_semantics=("parallel",),   # independent tiles -> 2 TCs
            vmem_limit_bytes=_VMEM_LIMIT_BYTES,
        ),
        cost_estimate=cost,
    )(p2, t2)

    # Tiny epilogue reduction + mean over the TRUE element count.
    return jnp.sum(partials) / jnp.float32(n_elems)


if __name__ == "__main__":
    key = jax.random.PRNGKey(0)
    k1, k2, k3, k4 = jax.random.split(key, 4)

    # Discriminator-style output: N, C, H, W (small synthetic shape).
    pred = jax.random.normal(k1, (2, 4, 16, 16), dtype=jnp.float32)
    truth = jax.random.normal(k2, (2, 4, 16, 16), dtype=jnp.float32)
    ref = jnp.mean((pred - truth) ** 2)

    # Force the Pallas path on the small shape so the kernel itself runs
    # (the default wrapper would take the small-input fast path).
    loss_pallas = jax.jit(
        functools.partial(lsgan_loss, min_pallas_elems=0))(pred, truth)
    jax.block_until_ready(loss_pallas)
    assert jnp.allclose(loss_pallas, ref, rtol=1e-5, atol=1e-6), (loss_pallas, ref)

    # Default wrapper: tiny input takes the fused-jnp fast path (same result).
    loss_fast = jax.jit(lsgan_loss)(pred, truth)
    jax.block_until_ready(loss_fast)
    assert jnp.allclose(loss_fast, ref, rtol=1e-5, atol=1e-6), (loss_fast, ref)

    # Ragged case exercising the in-kernel row mask (rows % tile_rows != 0).
    pred2 = jax.random.normal(k3, (2, 4, 24, 16), dtype=jnp.float32)
    truth2 = jax.random.normal(k4, (2, 4, 24, 16), dtype=jnp.float32)
    loss2 = jax.jit(
        functools.partial(lsgan_loss, min_pallas_elems=0))(pred2, truth2)
    jax.block_until_ready(loss2)
    ref2 = jnp.mean((pred2 - truth2) ** 2)
    assert jnp.allclose(loss2, ref2, rtol=1e-5, atol=1e-6), (loss2, ref2)

    print("KERNEL_OK")
</pallas_src>

<mosaic_0001>
module attributes {stable_mosaic.version = 11 : i64} {
  func.func @_mse_partial_kernel(%arg0: i32, %arg1: memref<8x128xf32, #tpu.memory_space<vmem>>, %arg2: memref<8x128xf32, #tpu.memory_space<vmem>>, %arg3: memref<8x128xf32, #tpu.memory_space<vmem>>) attributes {dimension_semantics = [#tpu.dimension_semantics<parallel>], iteration_bounds = array<i64: 2>, scalar_prefetch = 0 : i64, scratch_operands = 0 : i64, tpu.core_type = #tpu.core_type<tc>, window_params = [{transform_indices = @transform_0, window_bounds = array<i64: 8, 128>}, {transform_indices = @transform_1, window_bounds = array<i64: 8, 128>}, {transform_indices = @transform_2, window_bounds = array<i64: 8, 128>}]} {
    %cst = arith.constant 0.000000e+00 : f32
    %0 = vector.broadcast %cst : f32 to vector<8x128xf32>
    %c0_i32 = arith.constant 0 : i32
    %c8_i32 = arith.constant 8 : i32
    %1 = arith.muli %c0_i32, %c8_i32 : i32
    %2 = tpu.assume_multiple %1, 8 : i32
    %3 = arith.index_cast %2 : i32 to index
    %c0 = arith.constant 0 : index
    %4 = vector.load %arg1[%3, %c0] : memref<8x128xf32, #tpu.memory_space<vmem>>, vector<8x128xf32>
    %5 = arith.index_cast %2 : i32 to index
    %c0_0 = arith.constant 0 : index
    %6 = vector.load %arg2[%5, %c0_0] : memref<8x128xf32, #tpu.memory_space<vmem>>, vector<8x128xf32>
    %7 = arith.subf %4, %6 : vector<8x128xf32>
    %8 = arith.mulf %7, %7 : vector<8x128xf32>
    %9 = arith.addf %0, %8 : vector<8x128xf32>
    %c1_i32 = arith.constant 1 : i32
    %c0_1 = arith.constant 0 : index
    %c0_2 = arith.constant 0 : index
    %10 = vector.load %arg3[%c0_1, %c0_2] : memref<8x128xf32, #tpu.memory_space<vmem>>, vector<8x128xf32>
    tpu.vector_store %arg3[%c0_1, %c0_2], %9 {strides = array<i32>} : memref<8x128xf32, #tpu.memory_space<vmem>>, vector<8x128xf32>,
    return
  }
  func.func @transform_0(%arg0: i32) -> (i32, i32) {
    %c0_i32 = arith.constant 0 : i32
    %c0_i32_0 = arith.constant 0 : i32
    return %arg0, %c0_i32 : i32, i32
  }
  func.func @transform_1(%arg0: i32) -> (i32, i32) {
    %c0_i32 = arith.constant 0 : i32
    %c0_i32_0 = arith.constant 0 : i32
    return %arg0, %c0_i32 : i32, i32
  }
  func.func @transform_2(%arg0: i32) -> (i32, i32) {
    %c0_i32 = arith.constant 0 : i32
    %c0_i32_0 = arith.constant 0 : i32
    return %arg0, %c0_i32 : i32, i32
  }
}

</mosaic_0001>

<bundles_post_ra>
// kernel: lsgan_loss.1
= control target key start
LH: loop header
LB: loop body
LE: loop exit
PB: predicated region body
PF: predicated region fallthrough
CT: control target
= control target key end

     0   :  { %s249_s9 = smov 0   ;;  %s277_s0 = inlined_call_operand.vmem [shape: f32[16,128], index: 0, kind: input, shape index: {}]   ;;  %s278_s1 = inlined_call_operand.vmem [shape: f32[16,128], index: 1, kind: input, shape index: {}]   ;;  %s279_s2 = inlined_call_operand.vmem [shape: f32[16,128], index: 2, kind: output, shape index: {}]  }
   0x1 LB: > { %s227_s10 = sadd.s32 4294967295, %s251_s9   ;;  %p231_p0 = scmp.ge.s32.totalorder %s251_s9, 1  ;;  %s251_s9 = sphi %s249_s9, %s12_s9  }
   0x2   : > { %p120_p1 = scmp.lt.s32.totalorder %s251_s9, 3 }
   0x4   : > { %p121_p2 = pnand %p231_p0, %p120_p1 }
   0x5   : > { %p144_p3 = scmp.lt.s32.totalorder (!%p121_p2), %s227_s10, 1 }
   0x6   : > { %124 = sbr.rel (%p121_p2) target bundleno = 23 (0x17), region = 28 }
   0xd   : > { %s281_s10 = smov (!%p144_p3, %s227_s10), 1 }
   0xe   : > { %s232_s11 = sshll.u32 %s281_s10, 3 }
   0xf   : > { %s147_s14 = scalar_lea.vmem %s277_s0, %s232_s11  ;;  %s151_s17 = scalar_lea.vmem %s278_s1, %s232_s11 }
  0x10   : > { %v156_v0 = vld [vmem:[%s147_s14] sm:$0xff]  ;;  %s155_s20 = scalar_lea.vmem %s279_s2, %s232_s11 }
  0x11   : > { %v157_v1 = vld [vmem:[%s151_s17] sm:$0xff] }
  0x12   : > { %v158_v2 = vsub.f32 %v156_v0, %v157_v1 }
  0x14   : > { %v159_v3 = vmul.f32 %v158_v2, %v158_v2 }
  0x16   : > { %161 = vst [vmem:[%s155_s20] sm:$0xff] %v159_v3 }
  0x17 PF: > { %s12_s9 = sadd.s32 1, %s251_s9  }
  0x18   : > { %p9_p4 = scmp.ge.s32.totalorder %s12_s9, 4  }
  0x1a   :  { %11 = sbr.rel (!%p9_p4) target bundleno = 1 (0x1), region = 61 }

</bundles_post_ra>
